<compile_context>
chip_gen: v6e
topology: v6e:2x2x1
jax: 0.10.0
libtpu: 0.0.40
codegen_flags: <defaults>
</compile_context>

<pallas_src>
import jax
import jax.numpy as jnp
from jax.experimental import pallas as pl
from jax.experimental.pallas import tpu as pltpu


_TILE_BYTES = 4 * 1024 * 1024            # ~4 MiB per img / out tile
_RESIDENT_SCALE_LIMIT = 8 * 1024 * 1024  # keep scale+bias resident below this


def _round_up(x, m):
    return ((x + m - 1) // m) * m


def _make_kernel(rb, resident):
    def kernel(scale_ref, bias_ref, img_ref, out_ref):
        if resident:
            # scale/bias are full (R_pad, 1) f32 arrays resident in VMEM;
            # slice the rows for this grid step.
            r0 = pl.program_id(0) * rb
            if rb % 8 == 0:
                r0 = pl.multiple_of(r0, 8)
            s = scale_ref[pl.ds(r0, rb), :]
            b = bias_ref[pl.ds(r0, rb), :]
        else:
            s = scale_ref[...]
            b = bias_ref[...]
        # (img - mean) / std == img * (1/std) + (-mean/std); compute in f32.
        x = img_ref[...].astype(jnp.float32)
        out_ref[...] = (x * s + b).astype(out_ref.dtype)

    return kernel


def normalization_forward(img, mean, std, *, donate_input=False):
    """img: (N, C, H, W); mean/std: (C,).  Returns (img - mean[c]) / std[c]."""
    N, C, H, W = img.shape
    R, L = N * C, H * W
    dtype = img.dtype
    itemsize = jnp.dtype(dtype).itemsize

    # Per-channel scale/bias, kept in float32 (length-C work, negligible).
    mean_f = mean.astype(jnp.float32)
    std_f = std.astype(jnp.float32)
    scale_c = 1.0 / std_f
    bias_c = -mean_f / std_f

    x2 = img.reshape(R, L)

    # ---------------- tile sizing ----------------
    sub_align = 8 * max(1, 4 // itemsize)          # 8 for f32, 16 for bf16, ...
    budget_elems = max(_TILE_BYTES // itemsize, sub_align * 128)

    # Lane (minor) block: full row if a sub_align-row slab fits the budget,
    # otherwise the largest 128-multiple that does (ragged edge via cdiv grid).
    if L * sub_align <= budget_elems:
        lb = L
    else:
        lb = max(128, ((budget_elems // sub_align) // 128) * 128)

    # Row block: as many sublane-aligned rows as fit the budget with this lb.
    rb_max = max(sub_align, ((budget_elems // lb) // sub_align) * sub_align)
    rb = R if R <= rb_max else rb_max

    n_r, n_l = pl.cdiv(R, rb), pl.cdiv(L, lb)
    # Ensure >= 2 grid steps along a "parallel" axis when possible (v7x megacore).
    if n_r * n_l == 1:
        rb2 = _round_up(-(-R // 2), sub_align)
        lb2 = _round_up(-(-L // 2), 128)
        if rb2 < R:
            rb = rb2
        elif lb2 < L:
            lb = lb2
        n_r, n_l = pl.cdiv(R, rb), pl.cdiv(L, lb)

    grid = (n_r, n_l)
    R_pad = n_r * rb  # row extent covered by the grid (>= R)

    # Per-row scale/bias (row r <-> channel r % C), padded to R_pad rows so the
    # in-kernel dynamic slice never reads out of bounds on ragged row edges.
    row_scale = jnp.tile(scale_c, N)
    row_bias = jnp.tile(bias_c, N)
    if R_pad > R:
        pad = R_pad - R
        row_scale = jnp.concatenate([row_scale, jnp.ones((pad,), jnp.float32)])
        row_bias = jnp.concatenate([row_bias, jnp.zeros((pad,), jnp.float32)])
    row_scale = row_scale.reshape(R_pad, 1)
    row_bias = row_bias.reshape(R_pad, 1)

    # Keep scale/bias fully resident in VMEM unless R is pathologically large,
    # in which case fall back to small per-step blocked tiles.
    resident_bytes = 2 * R_pad * 128 * 4  # lane-padded f32 footprint
    resident = resident_bytes <= _RESIDENT_SCALE_LIMIT

    if resident:
        sb_specs = [
            pl.BlockSpec(memory_space=pltpu.MemorySpace.VMEM),
            pl.BlockSpec(memory_space=pltpu.MemorySpace.VMEM),
        ]
        sb_bytes = resident_bytes
    else:
        sb_specs = [
            pl.BlockSpec((rb, 1), lambda i, j: (i, 0)),
            pl.BlockSpec((rb, 1), lambda i, j: (i, 0)),
        ]
        sb_bytes = 2 * 2 * rb * 128 * 4

    tile_bytes = rb * lb * itemsize
    vmem_limit = int(4 * tile_bytes + sb_bytes + (4 << 20))  # dbl-buffered + margin
    vmem_limit = max(vmem_limit, 16 << 20)

    cost = pl.CostEstimate(
        flops=2 * R * L,
        transcendentals=0,
        bytes_accessed=2 * R * L * itemsize + 2 * R_pad * 4,
    )

    kernel = _make_kernel(rb, resident)

    out2 = pl.pallas_call(
        kernel,
        out_shape=jax.ShapeDtypeStruct((R, L), dtype),
        grid=grid,
        in_specs=sb_specs + [pl.BlockSpec((rb, lb), lambda i, j: (i, j))],
        out_specs=pl.BlockSpec((rb, lb), lambda i, j: (i, j)),
        compiler_params=pltpu.CompilerParams(
            dimension_semantics=("parallel", "parallel"),
            vmem_limit_bytes=vmem_limit,
        ),
        cost_estimate=cost,
        input_output_aliases=({2: 0} if donate_input else {}),
    )(row_scale, row_bias, x2)

    return out2.reshape(N, C, H, W)


if __name__ == "__main__":
    key = jax.random.PRNGKey(0)
    mean = jnp.array([0.485, 0.456, 0.406], dtype=jnp.float32)
    std = jnp.array([0.229, 0.224, 0.225], dtype=jnp.float32)

    # A few small deterministic shapes exercising the different tiling paths:
    #   (2,3,16,16): lane-split grid (1,2)
    #   (4,3,32,32): row-split grid with a ragged (padded) last row block
    #   (2,3,10,10): L not a multiple of 128, full-extent single block
    shapes = [(2, 3, 16, 16), (4, 3, 32, 32), (2, 3, 10, 10)]
    for idx, (N, C, H, W) in enumerate(shapes):
        k = jax.random.fold_in(key, idx)
        img = jax.random.uniform(k, (N, C, H, W), dtype=jnp.float32)
        out = normalization_forward(img, mean, std)
        out = jax.block_until_ready(out)
        ref = (img - mean.reshape(-1, 1, 1)) / std.reshape(-1, 1, 1)
        assert out.shape == (N, C, H, W)
        assert jnp.allclose(out, ref, atol=1e-5, rtol=1e-5), f"mismatch at {shapes[idx]}"

    print("KERNEL_OK")
</pallas_src>

<mosaic_0001>
module attributes {stable_mosaic.version = 11 : i64} {
  func.func @kernel(%arg0: i32, %arg1: i32, %arg2: memref<6x1xf32, #tpu.memory_space<vmem>>, %arg3: memref<6x1xf32, #tpu.memory_space<vmem>>, %arg4: memref<6x128xf32, #tpu.memory_space<vmem>>, %arg5: memref<6x128xf32, #tpu.memory_space<vmem>>) attributes {dimension_semantics = [#tpu.dimension_semantics<parallel>, #tpu.dimension_semantics<parallel>], iteration_bounds = array<i64: 1, 2>, scalar_prefetch = 0 : i64, scratch_operands = 0 : i64, tpu.core_type = #tpu.core_type<tc>, window_params = [{pipeline_mode = #tpu.pipeline_mode<synchronous>, transform_indices = @transform_0, window_bounds = array<i64: 6, 1>}, {pipeline_mode = #tpu.pipeline_mode<synchronous>, transform_indices = @transform_1, window_bounds = array<i64: 6, 1>}, {transform_indices = @transform_2, window_bounds = array<i64: 6, 128>}, {transform_indices = @transform_3, window_bounds = array<i64: 6, 128>}]} {
    %c6_i32 = arith.constant 6 : i32
    %0 = arith.muli %arg0, %c6_i32 : i32
    %1 = arith.index_cast %0 : i32 to index
    %c0 = arith.constant 0 : index
    %2 = vector.load %arg2[%1, %c0] : memref<6x1xf32, #tpu.memory_space<vmem>>, vector<6x1xf32>
    %3 = arith.index_cast %0 : i32 to index
    %c0_0 = arith.constant 0 : index
    %4 = vector.load %arg3[%3, %c0_0] : memref<6x1xf32, #tpu.memory_space<vmem>>, vector<6x1xf32>
    %c0_1 = arith.constant 0 : index
    %c0_2 = arith.constant 0 : index
    %5 = vector.load %arg4[%c0_1, %c0_2] : memref<6x128xf32, #tpu.memory_space<vmem>>, vector<6x128xf32>
    %6 = vector.broadcast %2 : vector<6x1xf32> to vector<6x128xf32>
    %7 = arith.mulf %5, %6 : vector<6x128xf32>
    %8 = vector.broadcast %4 : vector<6x1xf32> to vector<6x128xf32>
    %9 = arith.addf %7, %8 : vector<6x128xf32>
    %c0_3 = arith.constant 0 : index
    %c0_4 = arith.constant 0 : index
    %10 = vector.load %arg5[%c0_3, %c0_4] : memref<6x128xf32, #tpu.memory_space<vmem>>, vector<6x128xf32>
    tpu.vector_store %arg5[%c0_3, %c0_4], %9 {strides = array<i32>} : memref<6x128xf32, #tpu.memory_space<vmem>>, vector<6x128xf32>,
    return
  }
  func.func @transform_0(%arg0: i32, %arg1: i32) -> (i32, i32) {
    %c0_i32 = arith.constant 0 : i32
    %c0_i32_0 = arith.constant 0 : i32
    %c0_i32_1 = arith.constant 0 : i32
    return %c0_i32, %c0_i32_0 : i32, i32
  }
  func.func @transform_1(%arg0: i32, %arg1: i32) -> (i32, i32) {
    %c0_i32 = arith.constant 0 : i32
    %c0_i32_0 = arith.constant 0 : i32
    %c0_i32_1 = arith.constant 0 : i32
    return %c0_i32, %c0_i32_0 : i32, i32
  }
  func.func @transform_2(%arg0: i32, %arg1: i32) -> (i32, i32) {
    %c0_i32 = arith.constant 0 : i32
    return %arg0, %arg1 : i32, i32
  }
  func.func @transform_3(%arg0: i32, %arg1: i32) -> (i32, i32) {
    %c0_i32 = arith.constant 0 : i32
    return %arg0, %arg1 : i32, i32
  }
}

</mosaic_0001>

<bundles_post_ra>
// kernel: tpu_custom_call.1
= control target key start
LH: loop header
LB: loop body
LE: loop exit
PB: predicated region body
PF: predicated region fallthrough
CT: control target
= control target key end

     0   :  { %8 = vsyncpa [#allocation3], 0  ;;  %s581_s0 = inlined_call_operand.vmem [shape: f32[6,1], index: 0, kind: input, shape index: {}]   ;;  %s582_s1 = inlined_call_operand.vmem [shape: f32[6,1], index: 1, kind: input, shape index: {}]   ;;  %s583_s2 = inlined_call_operand.vmem [shape: f32[6,256], index: 2, kind: input, shape index: {}]   ;;  %s584_s3 = inlined_call_operand.hbm [shape: f32[6,256], index: 3, kind: output, shape index: {}]  }
   0x1   :  { %10 = vsyncpa [#allocation3 + $0x1], 0  ;;  %s476_s12 = smov 0   ;;  %s478_s13 = smov 0  }
   0x2   :  { %s480_s14 = smov 0   ;;  %s482_s15 = smov 0  }
   0x3   :  { %s484_s16 = smov 0   ;;  %s486_s17 = smov 0  }
   0x4 LB: > { %s308_s18 = sadd.s32 4294967295, %s452_s17   ;;  %s309_s19 = sadd.s32 4294967294, %s452_s17   ;;  %s452_s17 = sphi %s486_s17, %s16_s17   ;;  %s448_s16 = sphi %s484_s16, %s591_s16   ;;  %s444_s15 = sphi %s482_s15, %s590_s15   ;;  %s440_s14 = sphi %s480_s14, %s589_s14   ;;  %s436_s13 = sphi %s478_s13, %s588_s13   ;;  %s432_s12 = sphi %s476_s12, %s587_s12  }
   0x5   : > { %s25_s20 = sadd.s32 1, %s448_s16  ;;  %s107_s21 = sadd.s32 1, %s440_s14 }
   0x6   : > { %p26_p0 = scmp.ge.s32.totalorder %s25_s20, 2  ;;  %p117_p1 = scmp.ne.s32.totalorder %s440_s14, %s436_s13 }
   0x7   : > { %p118_p2 = scmp.eq.s32.totalorder %s308_s18, 1  ;;  %p123_p3 = scmp.ne.s32.totalorder %s436_s13, %s432_s12 }
   0x8   : > { %s593_s20 = smov (%p26_p0, %s25_s20), 0  ;;  %p124_p5 = scmp.eq.s32.totalorder %s309_s19, 1 }
   0x9   : > { %p516_p4 = por %p118_p2, %p117_p1  ;;  %s103_s23 = ssub.s32 %s448_s16, %s593_s20 }
   0xa   : > { %p312_p6 = scmp.ge.s32.totalorder %s452_s17, 1  ;;  %p105_p7 = scmp.eq.s32.totalorder %s103_s23, 0 }
   0xb   : > { %p523_p8 = por %p124_p5, %p123_p3  ;;  %p159_p9 = scmp.lt.s32.totalorder %s452_s17, 3 }
   0xc   : > { %s529_s25 = scalar_select %p105_p7, %s440_s14, %s107_s21  }
   0xd   : > { %p160_p10 = pnand %p312_p6, %p159_p9 }
   0xe   : > { %p188_p11 = scmp.lt.s32.totalorder (!%p160_p10), %s444_s15, 1  ;;  %s183_s4 = sand.u32 (!%p160_p10), 1, %s436_s13  }
   0xf   : > { %163 = sbr.rel (%p160_p10) target bundleno = 165 (0xa5), region = 32  ;;  %s313_s6 = sshll.u32 (!%p160_p10), %s183_s4, 3 }
  0x10   : > { %s316_s10 = sshll.u32 (!%p160_p10), %s444_s15, 7  ;;  %s185_s11 = scalar_lea.vmem (!%p160_p10), [#allocation2], %s313_s6 }
  0x11   : > { %s229_s18 = sshll.u32 (!%p160_p10), %s185_s11, 4  ;;  %s227_s23 = scalar_lea.hbm (!%p160_p10), %s584_s3, %s316_s10  ;;  %s230_s18 = int_to_ptr.vmem [resolvable:$true] %s229_s18 }
  0x12   : > { %s214_s26 = scalar_lea.sflag (!%p160_p10), [#allocation3], %s183_s4  ;;  %s376_s27 = scalar_lea.vmem (!%p160_p10), %s230_s18, 128 }
  0x13   : > { %p377_p12 = scmp.ne.s32.totalorder (!%p160_p10), %s230_s18, %s376_s27  ;;  %s455_s28 = smov (!%p160_p10), [#allocation2]  }
  0x14   : > { %v196_v0 = vld [vmem:[%s581_s0] sm:$0x3f]  ;;  %v454_v1 = vmov 0   ;;  %s189_s30 = scalar_select %p188_p11, %s444_s15, 1 }
  0x15   : > { %375 = vset.pattern.permute.xlu0 %v454_v1  ;;  %v198_v2 = vld [vmem:[%s582_s1] sm:$0x3f]  ;;  %p378_p13 = pnand %p377_p12, %p516_p4  ;;  %s380_s29 = sshll.u32 %s455_s28, 4  ;;  %s381_s29 = int_to_ptr.vmem [resolvable:$false] %s380_s29 }
  0x16   : > { %202 = vperm.xlu0 %375, %v196_v0   ;;  %s314_s5 = sshll.u32 %s189_s30, 3  ;;  %s382_s15 = scalar_lea.vmem %s381_s29, 256 }
  0x17   : > { %s193_s9 = scalar_lea.vmem %s583_s2, %s314_s5  ;;  %p379_p0 = pneg %p378_p13 }
  0x18   : > { %v199_v4 = vld [vmem:[%s193_s9] sm:$0x3f]  ;;  %p383_p1 = scmp.lt.s32.totalorder %s230_s18, %s381_s29  ;;  %p384_p2 = scmp.lt.s32.totalorder %s382_s15, %s376_s27 }
  0x1a   : > { %208 = vperm.xlu0 %375, %v198_v2   ;;  %p385_p3 = por %p384_p2, %p383_p1 }
  0x1c   : > { %p386_p5 = pnand %p385_p3, %p379_p0 }
  0x91   : > { %v203_v3 = vpop.permute.xlu0 %202 }
  0x92   : > { %v205_v5 = vmul.f32 %v203_v3, %v199_v4 }
  0x95   : > { %v209_v6 = vpop.permute.xlu0 %208 }
  0x96   : > { %v211_v7 = vadd.f32 %v209_v6, %v205_v5 }
  0x98   : > { %212 = vst [vmem:[%s185_s11] sm:$0x3f] %v211_v7 }
  0x99   : > { %389 = shalt.err (!%p386_p5)
}
  0x9a   : > { %s390_s30 = scalar_lea.hbm %s227_s23, 128  ;;  %s394_s6 = scalar_lea.hbm %s584_s3, 256 }
  0x9b   : > { %p391_p6 = scmp.ne.s32.totalorder %s227_s23, %s390_s30  ;;  %p395_p10 = scmp.lt.s32.totalorder %s227_s23, %s584_s3 }
  0x9c   : > { %p396_p11 = scmp.lt.s32.totalorder %s394_s6, %s390_s30 }
  0x9d   : > { %p392_p7 = pnand %p391_p6, %p516_p4 }
  0x9e   : > { %p397_p12 = por %p396_p11, %p395_p10 }
  0x9f   : > { %p393_p9 = pneg %p392_p7 }
  0xa1   : > { %p398_p13 = pnand %p397_p12, %p393_p9 }
  0xa3   : > { %401 = shalt.err (!%p398_p13)
}
  0xa4   : > { %319 = dma.vmem_to_hbm [thread:$0]  (%p516_p4), %s230_s18, 128, %s227_s23, %s214_s26  }
  0xa5 PF: > { %p325_p0 = scmp.ge.s32.totalorder %s452_s17, 2  ;;  %s241_s9 = sand.u32 1, %s432_s12  }
  0xa6   : > { %s242_s10 = scalar_lea.sflag [#allocation3], %s241_s9 }
  0xa7   : > { %p322_p1 = pnand %p325_p0, %p523_p8 }
  0xa9   : > { %p323_p2 = pneg %p322_p1 }
  0xab   : > { %427 = dma.done.wait (%p323_p2), %s242_s10, 128  }
  0xac   : > { %429 = vsyncadd (%p323_p2), %s242_s10, 4294967168  ;;  %s16_s17 = sadd.s32 1, %s452_s17   ;;  %s587_s12 = smov %s436_s13 }
  0xad   : > { %p13_p3 = scmp.ge.s32.totalorder %s16_s17, 4   ;;  %s588_s13 = smov %s440_s14 }
  0xae   : > { %s589_s14 = smov %s529_s25  ;;  %s590_s15 = smov %s448_s16 }
  0xaf   : > { %s591_s16 = smov %s593_s20  ;;  %15 = sbr.rel (!%p13_p3) target bundleno = 4 (0x4), region = 69 }
  0xb4   :  { %247 = vsyncpa [#allocation3], 1 }
  0xb5   :  { %249 = vsyncpa [#allocation3 + $0x1], 1 }

</bundles_post_ra>
